<compile_context>
chip_gen: v6e
topology: v6e:2x2x1
jax: 0.10.0
libtpu: 0.0.40
codegen_flags: <defaults>
</compile_context>

<pallas_src>
import functools
import math

import jax
import jax.numpy as jnp
from jax.experimental import pallas as pl
from jax.experimental.pallas import tpu as pltpu


# ------------------------------ tiling helpers -------------------------------

def _pick_tile(dim, target, mult):
    """Largest tile <= target that is a multiple of `mult` and divides `dim`.
    Falls back to the full dimension (full-array blocks are always legal)."""
    if dim <= target:
        return dim
    t = (target // mult) * mult
    while t >= mult:
        if dim % t == 0:
            return t
        t -= mult
    return dim


def _bytes(*arrays):
    return int(sum(int(a.size) * a.dtype.itemsize for a in arrays))


# --------------------- kernel: RMSNorm fused into a matmul -------------------

def _rmsnorm_matmul_kernel(x_ref, wn_ref, w_ref, o_ref, *, eps):
    x = x_ref[...].astype(jnp.float32)                     # [tm, K]
    inv = jax.lax.rsqrt(jnp.mean(x * x, axis=-1, keepdims=True) + eps)
    xn = (x * inv * wn_ref[...].astype(jnp.float32)).astype(w_ref.dtype)
    o_ref[...] = jnp.dot(
        xn, w_ref[...], preferred_element_type=jnp.float32
    ).astype(o_ref.dtype)


def rmsnorm_matmul(x2d, norm_w, w, *, eps=1e-6, tm=128, tn=256):
    """out = RMSNorm(x2d; norm_w) @ w   (x2d: [M, K], w: [K, N])."""
    M, K = x2d.shape
    N = w.shape[1]
    tm = _pick_tile(M, tm, 8)
    tn = _pick_tile(N, tn, 128)
    return pl.pallas_call(
        functools.partial(_rmsnorm_matmul_kernel, eps=eps),
        out_shape=jax.ShapeDtypeStruct((M, N), x2d.dtype),
        grid=(M // tm, N // tn),
        in_specs=[
            pl.BlockSpec((tm, K), lambda i, j: (i, 0)),
            pl.BlockSpec((1, K), lambda i, j: (0, 0)),
            pl.BlockSpec((K, tn), lambda i, j: (0, j)),
        ],
        out_specs=pl.BlockSpec((tm, tn), lambda i, j: (i, j)),
        compiler_params=pltpu.CompilerParams(
            dimension_semantics=("parallel", "parallel")
        ),
        cost_estimate=pl.CostEstimate(
            flops=2 * M * N * K + 6 * M * K,
            transcendentals=M,
            bytes_accessed=_bytes(x2d, w, norm_w) + M * N * x2d.dtype.itemsize,
        ),
    )(x2d, norm_w.reshape(1, K), w)


# ---------------- kernel: RMSNorm + gate/up matmuls + SiLU*up ----------------

def _rmsnorm_swiglu_kernel(x_ref, wn_ref, wg_ref, wu_ref, o_ref, *, eps):
    x = x_ref[...].astype(jnp.float32)
    inv = jax.lax.rsqrt(jnp.mean(x * x, axis=-1, keepdims=True) + eps)
    xn = (x * inv * wn_ref[...].astype(jnp.float32)).astype(wg_ref.dtype)
    g = jnp.dot(xn, wg_ref[...], preferred_element_type=jnp.float32)
    u = jnp.dot(xn, wu_ref[...], preferred_element_type=jnp.float32)
    o_ref[...] = (g * jax.nn.sigmoid(g) * u).astype(o_ref.dtype)


def rmsnorm_swiglu(x2d, norm_w, w_gate, w_up, *, eps=1e-6, tm=128, tn=256):
    """out = SiLU(RMSNorm(x) @ Wg) * (RMSNorm(x) @ Wu)   -> [M, intermediate]."""
    M, K = x2d.shape
    N = w_gate.shape[1]
    tm = _pick_tile(M, tm, 8)
    tn = _pick_tile(N, tn, 128)
    return pl.pallas_call(
        functools.partial(_rmsnorm_swiglu_kernel, eps=eps),
        out_shape=jax.ShapeDtypeStruct((M, N), x2d.dtype),
        grid=(M // tm, N // tn),
        in_specs=[
            pl.BlockSpec((tm, K), lambda i, j: (i, 0)),
            pl.BlockSpec((1, K), lambda i, j: (0, 0)),
            pl.BlockSpec((K, tn), lambda i, j: (0, j)),
            pl.BlockSpec((K, tn), lambda i, j: (0, j)),
        ],
        out_specs=pl.BlockSpec((tm, tn), lambda i, j: (i, j)),
        compiler_params=pltpu.CompilerParams(
            dimension_semantics=("parallel", "parallel")
        ),
        cost_estimate=pl.CostEstimate(
            flops=4 * M * N * K + 8 * M * K + 4 * M * N,
            transcendentals=M * N + M,
            bytes_accessed=_bytes(x2d, w_gate, w_up) + M * N * x2d.dtype.itemsize,
        ),
    )(x2d, norm_w.reshape(1, K), w_gate, w_up)


# ------------- kernel: tiled K-reduction matmul + fused residual -------------

def _matmul_residual_kernel(x_ref, w_ref, r_ref, o_ref, acc_ref):
    @pl.when(pl.program_id(2) == 0)
    def _():
        acc_ref[...] = jnp.zeros_like(acc_ref)

    acc_ref[...] += jnp.dot(
        x_ref[...], w_ref[...], preferred_element_type=jnp.float32
    )

    @pl.when(pl.program_id(2) == pl.num_programs(2) - 1)
    def _():
        o_ref[...] = (acc_ref[...] + r_ref[...].astype(jnp.float32)).astype(o_ref.dtype)


def matmul_residual(x2d, w, res, *, tm=128, tn=256, tk=512):
    """out = res + x2d @ w   (x2d: [M, K], w: [K, N], res: [M, N])."""
    M, K = x2d.shape
    N = w.shape[1]
    tm = _pick_tile(M, tm, 8)
    tn = _pick_tile(N, tn, 128)
    tk = _pick_tile(K, tk, 128)
    return pl.pallas_call(
        _matmul_residual_kernel,
        out_shape=jax.ShapeDtypeStruct((M, N), res.dtype),
        grid=(M // tm, N // tn, K // tk),
        in_specs=[
            pl.BlockSpec((tm, tk), lambda i, j, k: (i, k)),
            pl.BlockSpec((tk, tn), lambda i, j, k: (k, j)),
            pl.BlockSpec((tm, tn), lambda i, j, k: (i, j)),
        ],
        out_specs=pl.BlockSpec((tm, tn), lambda i, j, k: (i, j)),
        scratch_shapes=[pltpu.VMEM((tm, tn), jnp.float32)],
        compiler_params=pltpu.CompilerParams(
            dimension_semantics=("parallel", "parallel", "arbitrary")
        ),
        cost_estimate=pl.CostEstimate(
            flops=2 * M * N * K + M * N,
            transcendentals=0,
            bytes_accessed=_bytes(x2d, w, res) + M * N * res.dtype.itemsize,
        ),
    )(x2d, w, res)


# ----------------- kernel: per-head RMSNorm + RoPE (+ scale) -----------------

def _qknorm_rope_kernel(x_ref, wn_ref, cos_ref, sin_ref, o_ref, *, eps, out_scale):
    x = x_ref[0].astype(jnp.float32)                        # [ts, NH, hd]
    inv = jax.lax.rsqrt(jnp.mean(x * x, axis=-1, keepdims=True) + eps)
    xn = x * inv * wn_ref[...].astype(jnp.float32)          # (1, hd) broadcasts
    half = x.shape[-1] // 2
    x1 = xn[..., :half]
    x2 = xn[..., half:]
    c = cos_ref[...].astype(jnp.float32)[:, None, :]        # [ts, 1, hd/2]
    s = sin_ref[...].astype(jnp.float32)[:, None, :]
    o1 = (x1 * c - x2 * s) * out_scale
    o2 = (x2 * c + x1 * s) * out_scale
    o_ref[0] = jnp.concatenate([o1, o2], axis=-1).astype(o_ref.dtype)


def qknorm_rope(x, norm_w, cos_h, sin_h, *, eps=1e-6, out_scale=1.0, ts=128):
    """x: [B, S, NH, hd] -> RMSNorm over hd, then RoPE, then * out_scale."""
    B, S, NH, hd = x.shape
    half = hd // 2
    ts = _pick_tile(S, ts, 8)
    return pl.pallas_call(
        functools.partial(_qknorm_rope_kernel, eps=eps, out_scale=out_scale),
        out_shape=jax.ShapeDtypeStruct(x.shape, x.dtype),
        grid=(B, S // ts),
        in_specs=[
            pl.BlockSpec((1, ts, NH, hd), lambda b, si: (b, si, 0, 0)),
            pl.BlockSpec((1, hd), lambda b, si: (0, 0)),
            pl.BlockSpec((ts, half), lambda b, si: (si, 0)),
            pl.BlockSpec((ts, half), lambda b, si: (si, 0)),
        ],
        out_specs=pl.BlockSpec((1, ts, NH, hd), lambda b, si: (b, si, 0, 0)),
        compiler_params=pltpu.CompilerParams(
            dimension_semantics=("parallel", "parallel")
        ),
    )(x, norm_w.reshape(1, hd), cos_h, sin_h)


# ----------------- kernel: flash causal attention (GQA groups) ---------------

def _flash_attn_kernel(q_ref, k_ref, v_ref, o_ref, m_ref, l_ref, acc_ref):
    qi = pl.program_id(2)
    ki = pl.program_id(3)
    G, tq, D = q_ref.shape[2], q_ref.shape[3], q_ref.shape[4]
    tk = k_ref.shape[2]

    @pl.when(ki == 0)
    def _():
        m_ref[...] = jnp.full_like(m_ref, -1e30)
        l_ref[...] = jnp.zeros_like(l_ref)
        acc_ref[...] = jnp.zeros_like(acc_ref)

    q_start = qi * tq
    k_start = ki * tk

    # Skip kv blocks that lie entirely above the causal diagonal.
    @pl.when(k_start <= q_start + (tq - 1))
    def _():
        # Fold the GQA group into the matmul M dim: plain 2-D MXU matmuls,
        # each K/V tile is used once for all `group` query heads.
        q = q_ref[0, 0].reshape(G * tq, D)                    # [G*tq, D]
        k = k_ref[0, 0]                                       # [tk,   D]
        v = v_ref[0, 0]                                       # [tk,   D]
        s = jnp.dot(q, k.T, preferred_element_type=jnp.float32)  # [G*tq, tk]

        # Sequence position of each row (same for every group member).
        row = q_start + jax.lax.broadcasted_iota(
            jnp.int32, (G, tq, tk), 1).reshape(G * tq, tk)
        col = k_start + jax.lax.broadcasted_iota(jnp.int32, (G * tq, tk), 1)
        s = jnp.where(col <= row, s, -1e30)

        m_prev = m_ref[...]
        m_new = jnp.maximum(m_prev, jnp.max(s, axis=-1, keepdims=True))
        alpha = jnp.exp(m_prev - m_new)
        p = jnp.exp(s - m_new)
        l_ref[...] = alpha * l_ref[...] + jnp.sum(p, axis=-1, keepdims=True)
        acc_ref[...] = alpha * acc_ref[...] + jnp.dot(
            p.astype(v.dtype), v, preferred_element_type=jnp.float32)
        m_ref[...] = m_new

    @pl.when(ki == pl.num_programs(3) - 1)
    def _():
        out = acc_ref[...] * pl.reciprocal(l_ref[...], approx=True)
        o_ref[0, 0] = out.reshape(G, tq, D).astype(o_ref.dtype)


def flash_causal_attention(q, k, v, *, tq=128, tk=128):
    """q: [B, Hkv, G, S, D] (attention scale pre-folded), k/v: [B, Hkv, S, D]."""
    B, Hkv, G, S, D = q.shape
    tq = _pick_tile(S, tq, 8)
    tk = _pick_tile(S, tk, 128)
    return pl.pallas_call(
        _flash_attn_kernel,
        out_shape=jax.ShapeDtypeStruct(q.shape, q.dtype),
        grid=(B, Hkv, S // tq, S // tk),
        in_specs=[
            pl.BlockSpec((1, 1, G, tq, D), lambda b, h, qi, ki: (b, h, 0, qi, 0)),
            pl.BlockSpec((1, 1, tk, D), lambda b, h, qi, ki: (b, h, ki, 0)),
            pl.BlockSpec((1, 1, tk, D), lambda b, h, qi, ki: (b, h, ki, 0)),
        ],
        out_specs=pl.BlockSpec((1, 1, G, tq, D),
                               lambda b, h, qi, ki: (b, h, 0, qi, 0)),
        scratch_shapes=[
            pltpu.VMEM((G * tq, 1), jnp.float32),   # running max m
            pltpu.VMEM((G * tq, 1), jnp.float32),   # running denom l
            pltpu.VMEM((G * tq, D), jnp.float32),   # output accumulator
        ],
        compiler_params=pltpu.CompilerParams(
            dimension_semantics=("parallel", "parallel", "parallel", "arbitrary")
        ),
        cost_estimate=pl.CostEstimate(
            flops=2 * B * Hkv * G * S * S * D,          # ~2x over causal: advisory
            transcendentals=B * Hkv * G * S * S,
            bytes_accessed=_bytes(q, k, v) + int(q.size) * q.dtype.itemsize,
        ),
    )(q, k, v)


# ------------------------------- RoPE tables ----------------------------------

def rope_half_tables(seq_len, dim, theta):
    inv_freq = 1.0 / (theta ** (jnp.arange(0, dim, 2, dtype=jnp.float32) / dim))
    t = jnp.arange(seq_len, dtype=jnp.float32)
    freqs = jnp.outer(t, inv_freq)                 # [S, dim/2]  (cos/sin halves equal)
    return jnp.cos(freqs), jnp.sin(freqs)


# ------------------------------ QwenBlock forward -----------------------------

def qwen_block_forward(hidden_states, params, cfg, eps=1e-6):
    B, S, H = hidden_states.shape
    nh, nkv, hd = cfg["n_heads"], cfg["n_kv_heads"], cfg["head_dim"]
    G = nh // nkv

    x2d = hidden_states.reshape(B * S, H)

    # norm_1 fused into the QKV projection.
    qkv = rmsnorm_matmul(x2d, params["norm_1_w"], params["w_qkv"], eps=eps)
    q = qkv[:, : nh * hd].reshape(B, S, nh, hd)
    k = qkv[:, nh * hd : (nh + nkv) * hd].reshape(B, S, nkv, hd)
    v = qkv[:, (nh + nkv) * hd :].reshape(B, S, nkv, hd)

    # q_norm / k_norm + RoPE fused; attention scale folded into q.
    cos_h, sin_h = rope_half_tables(S, hd, cfg["rope_theta"])
    scale = 1.0 / math.sqrt(hd)
    q = qknorm_rope(q, params["q_norm_w"], cos_h, sin_h, eps=eps, out_scale=scale)
    k = qknorm_rope(k, params["k_norm_w"], cos_h, sin_h, eps=eps, out_scale=1.0)

    # GQA layout: q/out [B, Hkv, G, S, hd]; k/v [B, Hkv, S, hd].  Query head
    # h = kvh * G + g uses kv head h // G, matching the reference grouping.
    q = q.reshape(B, S, nkv, G, hd).transpose(0, 2, 3, 1, 4)
    k = k.transpose(0, 2, 1, 3)
    v = v.transpose(0, 2, 1, 3)

    attn = flash_causal_attention(q, k, v)                      # [B, Hkv, G, S, hd]
    attn2d = attn.transpose(0, 3, 1, 2, 4).reshape(B * S, nh * hd)

    # o_proj with the first residual fused into the epilogue: h = x + o_proj(attn)
    h = matmul_residual(attn2d, params["w_o"], x2d)

    # norm_2 + gate/up + SiLU fused; down proj with the second residual fused.
    gu = rmsnorm_swiglu(h, params["norm_2_w"], params["w_gate"], params["w_up"],
                        eps=eps)
    out = matmul_residual(gu, params["w_down"], h)

    return out.reshape(B, S, H)


# ------------------------------ pure-JAX reference ----------------------------

def qwen_block_reference(hidden_states, params, cfg, eps=1e-6):
    B, S, H = hidden_states.shape
    nh, nkv, hd = cfg["n_heads"], cfg["n_kv_heads"], cfg["head_dim"]
    G = nh // nkv
    x = hidden_states.astype(jnp.float32)

    def rms(v, w):
        return v * jax.lax.rsqrt(jnp.mean(v * v, axis=-1, keepdims=True) + eps) * w

    xn = rms(x, params["norm_1_w"]).reshape(B * S, H)
    qkv = xn @ params["w_qkv"]
    q = qkv[:, : nh * hd].reshape(B, S, nh, hd)
    k = qkv[:, nh * hd : (nh + nkv) * hd].reshape(B, S, nkv, hd)
    v = qkv[:, (nh + nkv) * hd :].reshape(B, S, nkv, hd)
    q = rms(q, params["q_norm_w"])
    k = rms(k, params["k_norm_w"])

    cos_h, sin_h = rope_half_tables(S, hd, cfg["rope_theta"])

    def rope(t):
        half = hd // 2
        t1, t2 = t[..., :half], t[..., half:]
        c = cos_h[None, :, None, :]
        s = sin_h[None, :, None, :]
        return jnp.concatenate([t1 * c - t2 * s, t2 * c + t1 * s], axis=-1)

    q, k = rope(q), rope(k)
    k_r = jnp.repeat(k, G, axis=2)
    v_r = jnp.repeat(v, G, axis=2)
    logits = jnp.einsum("bqhd,bkhd->bhqk", q, k_r) / math.sqrt(hd)
    mask = jnp.tril(jnp.ones((S, S), bool))
    logits = jnp.where(mask[None, None], logits, -1e30)
    p = jax.nn.softmax(logits, axis=-1)
    attn = jnp.einsum("bhqk,bkhd->bqhd", p, v_r).reshape(B * S, nh * hd)

    h = x.reshape(B * S, H) + attn @ params["w_o"]
    hn = rms(h, params["norm_2_w"])
    g = hn @ params["w_gate"]
    u = hn @ params["w_up"]
    out = h + (g * jax.nn.sigmoid(g) * u) @ params["w_down"]
    return out.reshape(B, S, H)


# ----------------------------------- main --------------------------------------

if __name__ == "__main__":
    # Small shapes consistent with the module's constructor.
    B, S = 2, 8
    hidden_size = 32
    n_heads = 4
    n_kv_heads = 2
    head_dim = hidden_size // n_heads        # 8
    intermediate = 64
    rope_theta = 10000.0

    cfg = dict(
        n_heads=n_heads,
        n_kv_heads=n_kv_heads,
        head_dim=head_dim,
        rope_theta=rope_theta,
    )

    key = jax.random.PRNGKey(0)
    keys = jax.random.split(key, 8)
    qkv_out = (n_heads + 2 * n_kv_heads) * head_dim

    params = {
        "norm_1_w": jnp.ones((hidden_size,), jnp.float32),
        "norm_2_w": jnp.ones((hidden_size,), jnp.float32),
        "q_norm_w": jnp.ones((head_dim,), jnp.float32),
        "k_norm_w": jnp.ones((head_dim,), jnp.float32),
        "w_qkv": 0.02 * jax.random.normal(keys[0], (hidden_size, qkv_out), jnp.float32),
        "w_o": 0.02 * jax.random.normal(keys[1], (n_heads * head_dim, hidden_size), jnp.float32),
        "w_gate": 0.02 * jax.random.normal(keys[2], (hidden_size, intermediate), jnp.float32),
        "w_up": 0.02 * jax.random.normal(keys[3], (hidden_size, intermediate), jnp.float32),
        "w_down": 0.02 * jax.random.normal(keys[4], (intermediate, hidden_size), jnp.float32),
    }

    hidden_states = jax.random.normal(keys[5], (B, S, hidden_size), jnp.float32)

    out = qwen_block_forward(hidden_states, params, cfg)
    out = jax.block_until_ready(out)
    assert out.shape == (B, S, hidden_size)
    assert bool(jnp.all(jnp.isfinite(out)))

    ref = jax.block_until_ready(qwen_block_reference(hidden_states, params, cfg))
    max_err = float(jnp.max(jnp.abs(out - ref)))
    assert max_err < 2e-2, max_err

    print("KERNEL_OK")
</pallas_src>

<mosaic_0001>
module attributes {stable_mosaic.version = 11 : i64} {
  func.func @_rmsnorm_matmul_kernel(%arg0: i32, %arg1: i32, %arg2: memref<16x32xf32, #tpu.memory_space<vmem>>, %arg3: memref<1x32xf32, #tpu.memory_space<vmem>>, %arg4: memref<32x64xf32, #tpu.memory_space<vmem>>, %arg5: memref<16x64xf32, #tpu.memory_space<vmem>>) attributes {dimension_semantics = [#tpu.dimension_semantics<parallel>, #tpu.dimension_semantics<parallel>], iteration_bounds = array<i64: 1, 1>, scalar_prefetch = 0 : i64, scratch_operands = 0 : i64, tpu.core_type = #tpu.core_type<tc>, window_params = [{transform_indices = @transform_0, window_bounds = array<i64: 16, 32>}, {pipeline_mode = #tpu.pipeline_mode<synchronous>, transform_indices = @transform_1, window_bounds = array<i64: 1, 32>}, {transform_indices = @transform_2, window_bounds = array<i64: 32, 64>}, {transform_indices = @transform_3, window_bounds = array<i64: 16, 64>}]} {
    %c0 = arith.constant 0 : index
    %c0_0 = arith.constant 0 : index
    %0 = vector.load %arg2[%c0, %c0_0] : memref<16x32xf32, #tpu.memory_space<vmem>>, vector<16x32xf32>
    %1 = arith.mulf %0, %0 : vector<16x32xf32>
    %cst = arith.constant dense<0.000000e+00> : vector<16xf32>
    %2 = vector.multi_reduction <add>, %1, %cst [1] : vector<16x32xf32> to vector<16xf32>
    %3 = vector.shape_cast %2 : vector<16xf32> to vector<16x1xf32>
    %cst_1 = arith.constant 3.200000e+01 : f32
    %4 = vector.broadcast %cst_1 : f32 to vector<16x1xf32>
    %5 = arith.divf %3, %4 : vector<16x1xf32>
    %cst_2 = arith.constant 9.99999997E-7 : f32
    %6 = vector.broadcast %cst_2 : f32 to vector<16x1xf32>
    %7 = arith.addf %5, %6 : vector<16x1xf32>
    %8 = math.rsqrt %7 : vector<16x1xf32>
    %9 = vector.broadcast %8 : vector<16x1xf32> to vector<16x32xf32>
    %10 = arith.mulf %0, %9 : vector<16x32xf32>
    %c0_3 = arith.constant 0 : index
    %c0_4 = arith.constant 0 : index
    %11 = vector.load %arg3[%c0_3, %c0_4] : memref<1x32xf32, #tpu.memory_space<vmem>>, vector<1x32xf32>
    %12 = vector.broadcast %11 : vector<1x32xf32> to vector<16x32xf32>
    %13 = arith.mulf %10, %12 : vector<16x32xf32>
    %c0_5 = arith.constant 0 : index
    %c0_6 = arith.constant 0 : index
    %14 = vector.load %arg4[%c0_5, %c0_6] : memref<32x64xf32, #tpu.memory_space<vmem>>, vector<32x64xf32>
    %cst_7 = arith.constant dense<0.000000e+00> : vector<16x64xf32>
    %15 = tpu.matmul %13, %14, %cst_7 {dimension_numbers = #tpu.dot_dimension_numbers<[1], [0], [0], [1], [0, 0, 1, 1], [], []>} : vector<16x32xf32>, vector<32x64xf32>, vector<16x64xf32> -> vector<16x64xf32>
    %c0_8 = arith.constant 0 : index
    %c0_9 = arith.constant 0 : index
    %16 = vector.load %arg5[%c0_8, %c0_9] : memref<16x64xf32, #tpu.memory_space<vmem>>, vector<16x64xf32>
    tpu.vector_store %arg5[%c0_8, %c0_9], %15 {strides = array<i32>} : memref<16x64xf32, #tpu.memory_space<vmem>>, vector<16x64xf32>,
    return
  }
  func.func @transform_0(%arg0: i32, %arg1: i32) -> (i32, i32) {
    %c0_i32 = arith.constant 0 : i32
    %c0_i32_0 = arith.constant 0 : i32
    return %arg0, %c0_i32 : i32, i32
  }
  func.func @transform_1(%arg0: i32, %arg1: i32) -> (i32, i32) {
    %c0_i32 = arith.constant 0 : i32
    %c0_i32_0 = arith.constant 0 : i32
    %c0_i32_1 = arith.constant 0 : i32
    return %c0_i32, %c0_i32_0 : i32, i32
  }
  func.func @transform_2(%arg0: i32, %arg1: i32) -> (i32, i32) {
    %c0_i32 = arith.constant 0 : i32
    %c0_i32_0 = arith.constant 0 : i32
    return %c0_i32, %arg1 : i32, i32
  }
  func.func @transform_3(%arg0: i32, %arg1: i32) -> (i32, i32) {
    %c0_i32 = arith.constant 0 : i32
    return %arg0, %arg1 : i32, i32
  }
}

</mosaic_0001>

<bundles_post_ra>
// kernel: tpu_custom_call.1
= control target key start
LH: loop header
LB: loop body
LE: loop exit
PB: predicated region body
PF: predicated region fallthrough
CT: control target
= control target key end

     0   :  { %8 = vsyncpa [#allocation3], 0  ;;  %s323_s0 = inlined_call_operand.hbm [shape: f32[16,32], index: 0, kind: input, shape index: {}]   ;;  %s324_s1 = inlined_call_operand.vmem [shape: f32[1,32], index: 1, kind: input, shape index: {}]   ;;  %s325_s2 = inlined_call_operand.hbm [shape: f32[32,64], index: 2, kind: input, shape index: {}]   ;;  %s326_s3 = inlined_call_operand.hbm [shape: f32[16,64], index: 3, kind: output, shape index: {}]  }
   0x1   :  { %9 = vsyncpa [#allocation6], 0 }
   0x2   :  { %10 = vsyncpa [#allocation4], 0  ;;  %s273_s12 = smov [#allocation2]  }
   0x3   :  { %s16_s13 = sshll.u32 %s273_s12, 4  ;;  %s17_s13 = int_to_ptr.vmem [resolvable:$true] %s16_s13 }
   0x4   :  { %s215_s14 = scalar_lea.vmem %s17_s13, 256  ;;  %p220_p1 = scmp.lt.s32.totalorder %s17_s13, %s17_s13 }
   0x5   :  { %p216_p0 = scmp.ne.s32.totalorder %s17_s13, %s215_s14  ;;  %p221_p2 = scmp.lt.s32.totalorder %s215_s14, %s215_s14 }
   0x7   :  { %p222_p3 = por %p221_p2, %p220_p1 }
   0x9   :  { %p223_p4 = pnand %p222_p3, %p216_p0 }
   0xb   :  { %226 = shalt.err (!%p223_p4)
}
   0xc   :  { %s274_s15 = smov 128   ;;  %s275_s16 = smov 8  }
   0xd   :  { %22 = dma.hbm_to_vmem [thread:$0]  %s323_s0, 256, %s17_s13, [#allocation3], %s274_s15, %s274_s15, %s275_s16  }
   0xe   :  { %s276_s19 = smov [#allocation5]  }
   0xf   :  { %s30_s20 = sshll.u32 %s276_s19, 4  ;;  %s31_s20 = int_to_ptr.vmem [resolvable:$true] %s30_s20 }
  0x10   :  { %s235_s21 = scalar_lea.vmem %s31_s20, 512  ;;  %p240_p6 = scmp.lt.s32.totalorder %s31_s20, %s31_s20 }
  0x11   :  { %p236_p5 = scmp.ne.s32.totalorder %s31_s20, %s235_s21  ;;  %p241_p7 = scmp.lt.s32.totalorder %s235_s21, %s235_s21 }
  0x13   :  { %p242_p8 = por %p241_p7, %p240_p6 }
  0x15   :  { %p243_p9 = pnand %p242_p8, %p236_p5 }
  0x17   :  { %246 = shalt.err (!%p243_p9)
}
  0x18   :  { %36 = dma.hbm_to_vmem [thread:$0]  %s325_s2, 512, %s31_s20, [#allocation6], %s274_s15, %s274_s15, %s275_s16  }
  0x19   :  { %267 = dma.done.wait [#allocation3], 256  }
  0x1a   :  { %268 = vsyncadd [#allocation3], 4294967040 }
  0x1b   :  { %269 = dma.done.wait [#allocation6], 512  }
  0x1c   :  { %270 = vsyncadd [#allocation6], 4294966784  ;;  %v43_v0 = vld [vmem:[#allocation2] sm:$0xff]  ;;  %vm47_vm0 = vcmask 261120   ;;  %v44_v1 = vld [vmem:[#allocation2 + $0x8] sm:$0xff]  ;;  %vm157_vm1 = vcmask 523264  }
  0x1d   :  { %v45_v2 = vmul.f32 %v43_v0, %v43_v0  ;;  %v46_v3 = vmul.f32 %v44_v1, %v44_v1  ;;  %v75_v6 = vld [vmem:[#allocation5 + $0x18] sm:$0xff]  ;;  %v74_v7 = vld [vmem:[#allocation5 + $0x10] sm:$0xff]  ;;  %v73_v8 = vld [vmem:[#allocation5 + $0x8] sm:$0xff]  ;;  %s277_s24 = smov [#allocation7]  }
  0x1e   :  { %187 = vmatprep.subr.mxu0 %v75_v6  ;;  %v72_v9 = vld [vmem:[#allocation5] sm:$0xff]  ;;  %v178_v17 = vld [vmem:[%s324_s1] ss:$0 sm:$0xff]  ;;  %s165_s25 = sshll.u32 %s277_s24, 4  ;;  %s166_s25 = int_to_ptr.vmem [resolvable:$true] %s165_s25 }
  0x1f   :  { %v48_v4 = vsel %vm47_vm0, %v45_v2, 0.0  ;;  %v51_v5 = vsel %vm47_vm0, %v46_v3, 0.0  ;;  %188 = vmatpush3.msra.mxu0 %v75_v6  ;;  %s247_s26 = scalar_lea.vmem %s166_s25, 256  ;;  %p252_p11 = scmp.lt.s32.totalorder %s166_s25, %s166_s25 }
  0x20   :  { %49 = vadd.xlane.f32.xlu0 %v48_v4  ;;  %189 = vmatprep.subr.mxu0 %v74_v7  ;;  %p248_p10 = scmp.ne.s32.totalorder %s166_s25, %s247_s26  ;;  %p253_p12 = scmp.lt.s32.totalorder %s247_s26, %s247_s26 }
  0x21   :  { %190 = vmatpush3.msra.mxu0 %v74_v7 }
  0x22   :  { %191 = vmatprep.subr.mxu0 %v73_v8  ;;  %p254_p13 = por %p253_p12, %p252_p11 }
  0x23   :  { %192 = vmatpush3.msra.mxu0 %v73_v8 }
  0x24   :  { %52 = vadd.xlane.f32.xlu0 %v51_v5  ;;  %193 = vmatprep.subr.mxu0 %v72_v9  ;;  %p255_p0 = pnand %p254_p13, %p248_p10 }
  0x25   :  { %194 = vmatpush3.msra.mxu0 %v72_v9 }
  0xa9   :  { %v50_v10 = vpop.xlane.xlu0 %49 }
  0xaa   :  { %v55_v11 = vmul.f32 0.03125, %v50_v10 }
  0xac   :  { %v57_v12 = vadd.f32 1e-06, %v55_v11 }
  0xad   :  { %v53_v13 = vpop.xlane.xlu0 %52 }
  0xae   :  { %203 = vrsqrt.f32 %v57_v12  ;;  %v56_v14 = vmul.f32 0.03125, %v53_v13 }
  0xb0   :  { %v58_v15 = vadd.f32 1e-06, %v56_v14 }
  0xb2   :  { %205 = vrsqrt.f32 %v58_v15 }
  0xbb   :  { %v204_v16 = vpop.eup %203 }
  0xbc   :  { %v61_v18 = vmul.f32 %v204_v16, %v43_v0 }
  0xbe   :  { %v70_v19 = vmul.f32 %v178_v17, %v61_v18 }
  0xbf   :  { %v206_v20 = vpop.eup %205 }
  0xc0   :  { %v62_v21 = vmul.f32 %v206_v20, %v44_v1  ;;  %195 = vmatprep.mubr.msk.f32.mxu0 %vm47_vm0, %v70_v19 }
  0xc2   :  { %v71_v22 = vmul.f32 %v178_v17, %v62_v21 }
  0xc4   :  { %196 = vmatmul.mubr.msk.f32.vlgmr.msra.gmra.mxu0 %vm47_vm0, %v71_v22 }
 0x184   :  { %v197_v23 = vpop.f32.mrf.mxu0 }
 0x185   :  { %159 = vst.msk [vmem:[#allocation7 + $0x8] sm:$0xff] %vm157_vm1, %v197_v23 }
 0x186   :  { %v148_v24 = vpop.f32.mrf.mxu0 }
 0x187   :  { %158 = vst.msk [vmem:[#allocation7] sm:$0xff] %vm157_vm1, %v148_v24 }
 0x188   :  { %258 = shalt.err (!%p255_p0)
}
 0x189   :  { %171 = dma.vmem_to_hbm [thread:$0]  %s166_s25, 256, %s326_s3, [#allocation4], %s274_s15, %s274_s15, %s275_s16  }
 0x18a   :  { %271 = dma.done.wait [#allocation4], 256  }
 0x18b   :  { %272 = vsyncadd [#allocation4], 4294967040 }
 0x18c   :  { %175 = vsyncpa [#allocation3], 1 }
 0x18d   :  { %176 = vsyncpa [#allocation6], 1 }
 0x18e   :  { %177 = vsyncpa [#allocation4], 1 }

</bundles_post_ra>
